<compile_context>
chip_gen: v5e
topology: v5e:2x2
jax: 0.10.0
libtpu: 0.0.40
codegen_flags: <defaults>
</compile_context>

<pallas_src>
import functools

import jax
import jax.numpy as jnp
from jax import lax
from jax.experimental import pallas as pl
from jax.experimental.pallas import tpu as pltpu

LANES = 128
MAX_TILE_ROWS = 2048      # 2048 x 128 f32 = 1 MiB per stream per buffer
CHUNK_ROWS = 256          # in-kernel sub-chunk size (keeps temporaries vreg-sized)
MIN_KERNEL_ROWS = 8       # below this the whole reduction runs in plain JAX


def _round_up(x, m):
    return ((x + m - 1) // m) * m


def _num_tensorcores():
    """2 on 2-TensorCore chips (v7x); 1 on single-TC v5e / v6e."""
    try:
        kind = jax.devices()[0].device_kind.lower()
    except Exception:
        return 1
    return 2 if "v7" in kind else 1


def _loss_sums_kernel(*refs, pos_w, neg_w, compute_depth, compute_heat,
                      compute_chamfer, tiles_per_core, tile_r, chunk_r,
                      valid_rows, num_tiles):
    """Accumulates partial sums into a resident (1, 5, 8, 128) VMEM block:
       [0]=sum |td-od|*mask_d  [1]=sum mask_d  [2]=sum weighted BCE*mask_d
       [3]=sum chamfer BCE     [4]=sum mask_c
    """
    refs = list(refs)
    acc_ref = refs.pop()
    idx = 0
    td_ref = od_ref = oh_ref = th_ref = ch_ref = None
    if compute_depth or compute_heat:
        td_ref = refs[idx]; idx += 1
    if compute_depth:
        od_ref = refs[idx]; idx += 1
    if compute_heat or compute_chamfer:
        oh_ref = refs[idx]; idx += 1
    if compute_heat:
        th_ref = refs[idx]; idx += 1
    if compute_chamfer:
        ch_ref = refs[idx]; idx += 1

    c = pl.program_id(0)
    i = pl.program_id(1)
    tile_idx = c * tiles_per_core + i

    @pl.when(i == 0)
    def _init():
        acc_ref[...] = jnp.zeros_like(acc_ref)

    def process_chunk(off, masked):
        """off: row offset of this chunk inside the tile (static or traced)."""
        if masked:
            # Logical row ids of this chunk; rows past `valid_rows` (the ragged
            # tail of the last block) are zeroed *before* any math so garbage /
            # NaN pad rows cannot leak into the sums.
            row0 = tile_idx * tile_r + off
            row_ids = row0 + lax.broadcasted_iota(jnp.int32, (chunk_r, LANES), 0)
            valid = row_ids < valid_rows

        def load(ref):
            x = ref[pl.ds(off, chunk_r), :].astype(jnp.float32)
            if masked:
                x = jnp.where(valid, x, 0.0)
            return x

        def fold(v):  # (chunk_r, 128) -> (8, 128); pure VPU vreg adds
            return jnp.sum(v.reshape(chunk_r // 8, 8, LANES), axis=0)

        if compute_depth or compute_heat:
            td = load(td_ref)
            mask_d = (td > 0.0).astype(jnp.float32)
            acc_ref[0, 1, :, :] += fold(mask_d)

        if compute_depth:
            od = load(od_ref)
            acc_ref[0, 0, :, :] += fold(jnp.abs(td - od) * mask_d)

        if compute_heat or compute_chamfer:
            oh = load(oh_ref)
            # torch.nn.BCELoss clamps the log terms at -100.
            log_1mo = jnp.maximum(jnp.log(1.0 - oh), -100.0)

        if compute_heat:
            th = load(th_ref)
            log_o = jnp.maximum(jnp.log(oh), -100.0)
            bce = -(th * log_o + (1.0 - th) * log_1mo)
            bal = jnp.where(th > 0.0, pos_w, neg_w)
            acc_ref[0, 2, :, :] += fold(bce * bal * mask_d)

        if compute_chamfer:
            ch = load(ch_ref)
            mask_c = (ch > 0.0).astype(jnp.float32)
            acc_ref[0, 3, :, :] += fold((-log_1mo) * (ch * ch) * mask_c)
            acc_ref[0, 4, :, :] += fold(mask_c)

    n_chunks = tile_r // chunk_r

    def process_tile(masked):
        if n_chunks == 1:
            process_chunk(0, masked)          # static offset
        else:
            def body(j, carry):
                off = pl.multiple_of(j * chunk_r, chunk_r)
                process_chunk(off, masked)
                return carry
            lax.fori_loop(0, n_chunks, body, 0)

    tail_is_partial = (valid_rows % tile_r) != 0
    if tail_is_partial:
        is_tail = tile_idx == num_tiles - 1

        @pl.when(jnp.logical_not(is_tail))
        def _interior():
            process_tile(masked=False)

        @pl.when(is_tail)
        def _tail():
            process_tile(masked=True)
    else:
        process_tile(masked=False)


def _jax_partial_sums(td, od, oh, th, ch, pos_w, neg_w,
                      compute_depth, compute_heat, compute_chamfer):
    """Same five partial sums as the kernel, over small 1-D tail segments."""
    z = jnp.float32(0.0)
    l1 = cnt_d = hm = chs = cnt_c = z
    if compute_depth or compute_heat:
        tdf = td.astype(jnp.float32)
        mask_d = (tdf > 0.0).astype(jnp.float32)
        cnt_d = jnp.sum(mask_d)
    if compute_depth:
        odf = od.astype(jnp.float32)
        l1 = jnp.sum(jnp.abs(tdf - odf) * mask_d)
    if compute_heat or compute_chamfer:
        ohf = oh.astype(jnp.float32)
        log_1mo = jnp.maximum(jnp.log(1.0 - ohf), -100.0)
    if compute_heat:
        thf = th.astype(jnp.float32)
        log_o = jnp.maximum(jnp.log(ohf), -100.0)
        bce = -(thf * log_o + (1.0 - thf) * log_1mo)
        bal = jnp.where(thf > 0.0, pos_w, neg_w)
        hm = jnp.sum(bce * bal * mask_d)
    if compute_chamfer:
        chf = ch.astype(jnp.float32)
        mask_c = (chf > 0.0).astype(jnp.float32)
        chs = jnp.sum((-log_1mo) * (chf * chf) * mask_c)
        cnt_c = jnp.sum(mask_c)
    return jnp.stack([l1, cnt_d, hm, chs, cnt_c])


def plain_loss(loss_input, config):
    cfg = config["loss"]
    w_depth = cfg.get("depth_pred_loss_weight", 0)
    w_heat = cfg.get("heatmap_loss_weight", 0)
    w_chamfer = cfg.get("chamfer_loss_weight", 0)
    neg_w = float(cfg.get("heatmap_negative_weight", 0.0))
    pos_w = 1.0 - neg_w

    output_depth = loss_input["output_depth"]
    target_depth = loss_input["target_depth"]
    output_heatmap = loss_input["output_heatmap"]
    target_heatmap = loss_input["target_heatmap"]
    chamfer = loss_input.get("chamfer_offset_map")

    compute_depth = (w_depth > 0) and (output_depth is not None)
    compute_heat = w_heat > 0
    compute_chamfer = (w_chamfer > 0) and (chamfer is not None)

    loss_dict = {}
    if not (compute_depth or compute_heat or compute_chamfer):
        return jnp.float32(0.0), loss_dict

    # TODO(synk): nearest-neighbour interpolate branch for mismatched heatmap
    # sizes is not implemented; heatmaps must match target_depth's H, W.

    streams = []                       # (name, array) in kernel argument order
    if compute_depth or compute_heat:
        streams.append(("td", target_depth))
    if compute_depth:
        streams.append(("od", output_depth))
    if compute_heat or compute_chamfer:
        streams.append(("oh", output_heatmap))
    if compute_heat:
        streams.append(("th", target_heatmap))
    if compute_chamfer:
        streams.append(("ch", chamfer))

    flats = {name: x.reshape(-1) for name, x in streams}
    n_elems = flats[streams[0][0]].shape[0]
    for name, _ in streams:
        if flats[name].shape[0] != n_elems:
            raise NotImplementedError("all loss maps must have the same size")

    rows = n_elems // LANES
    main_n = rows * LANES
    use_kernel = rows >= MIN_KERNEL_ROWS

    if use_kernel:
        # Native-dtype, lane-dense views (copy-free reshape when aligned; only
        # a prefix slice when a <128-element lane tail exists).
        slabs = []
        for name, _ in streams:
            f = flats[name]
            slabs.append((f if main_n == n_elems else f[:main_n]).reshape(rows, LANES))
        tails = ({name: flats[name][main_n:] for name, _ in streams}
                 if main_n != n_elems else None)

        # Sub-32-bit dtypes pack along sublanes: 8 (f32) / 16 (bf16) / 32 (8-bit).
        row_quant = 8
        for s in slabs:
            row_quant = max(row_quant, 8 * max(1, 4 // s.dtype.itemsize))

        def pick_tile(nt):
            t = _round_up(pl.cdiv(rows, nt), row_quant)
            if t > CHUNK_ROWS:
                t = _round_up(t, CHUNK_ROWS)
            return min(t, MAX_TILE_ROWS)

        core_split = _num_tensorcores()
        if core_split > 1:
            nt = _round_up(max(1, pl.cdiv(rows, MAX_TILE_ROWS)), core_split)
            tile_r = pick_tile(nt)
            if pl.cdiv(rows, tile_r) != nt:
                core_split = 1    # degenerate size: a 2-way split would only add waste
        if core_split == 1:
            tile_r = pick_tile(1)
            nt = pl.cdiv(rows, tile_r)
        tiles_per_core = nt // core_split
        chunk_r = min(CHUNK_ROWS, tile_r)

        kernel = functools.partial(
            _loss_sums_kernel, pos_w=pos_w, neg_w=neg_w,
            compute_depth=compute_depth, compute_heat=compute_heat,
            compute_chamfer=compute_chamfer, tiles_per_core=tiles_per_core,
            tile_r=tile_r, chunk_r=chunk_r, valid_rows=rows, num_tiles=nt)

        def in_map(c, i):
            return (c * tiles_per_core + i, 0)

        acc = pl.pallas_call(
            kernel,
            out_shape=jax.ShapeDtypeStruct((core_split, 5, 8, LANES), jnp.float32),
            grid=(core_split, tiles_per_core),
            in_specs=[pl.BlockSpec((tile_r, LANES), in_map) for _ in slabs],
            out_specs=pl.BlockSpec((1, 5, 8, LANES), lambda c, i: (c, 0, 0, 0)),
            compiler_params=pltpu.CompilerParams(
                dimension_semantics=("parallel", "arbitrary"),
                vmem_limit_bytes=32 * 1024 * 1024),
        )(*slabs)
        sums = jnp.sum(acc, axis=(0, 2, 3))   # (5,) final cross-lane reduce in JAX
    else:
        tails = flats                          # degenerate size: pure JAX path
        sums = jnp.zeros((5,), jnp.float32)

    if tails is not None and tails[streams[0][0]].shape[0] > 0:
        sums = sums + _jax_partial_sums(
            tails.get("td"), tails.get("od"), tails.get("oh"),
            tails.get("th"), tails.get("ch"), pos_w, neg_w,
            compute_depth, compute_heat, compute_chamfer)

    l1_sum, cnt_d, hm_sum, ch_sum, cnt_c = (sums[0], sums[1], sums[2],
                                            sums[3], sums[4])

    losses = []
    if compute_depth:
        has_d = cnt_d > 0
        depth_pred_loss = jnp.where(has_d, l1_sum / jnp.maximum(cnt_d, 1.0), 0.0)
        # NOTE: reference also runs GradLoss.imgrad_yx on both depth maps but the
        # result never enters the returned loss, so it is omitted.
        loss_dict["depth_pred_loss"] = depth_pred_loss
        losses.append(w_depth * depth_pred_loss)
    if compute_heat:
        has_d = cnt_d > 0
        heatmap_loss = jnp.where(has_d, hm_sum / jnp.maximum(cnt_d, 1.0), 0.0)
        loss_dict["heatmap_loss"] = heatmap_loss
        losses.append(w_heat * heatmap_loss)
    if compute_chamfer:
        has_c = cnt_c > 0
        chamfer_loss = jnp.where(has_c, ch_sum / jnp.maximum(cnt_c, 1.0), 0.0)
        loss_dict["chamfer_loss"] = chamfer_loss
        losses.append(jnp.where(has_c, w_chamfer * chamfer_loss, 0.0))

    # TODO(synk): LocationLoss / DescriptionLoss / rgb+pcd heatmap branches are
    # undefined or unused in the reference source and are not translated.
    return sum(losses), loss_dict


def _make_inputs(key, shape):
    k1, k2, k3, k4, k5 = jax.random.split(key, 5)
    output_depth = jax.random.uniform(k1, shape, jnp.float32, 0.0, 5.0)
    td_raw = jax.random.uniform(k2, shape, jnp.float32, -2.0, 5.0)
    target_depth = jnp.where(td_raw > 0, td_raw, 0.0)          # ~70% valid
    output_heatmap = jax.nn.sigmoid(jax.random.normal(k3, shape, jnp.float32))
    target_heatmap = (jax.random.uniform(k4, shape) > 0.8).astype(jnp.float32)
    ch_raw = jax.random.uniform(k5, shape, jnp.float32, -1.0, 1.0)
    chamfer = jnp.where(ch_raw > 0, ch_raw, 0.0)
    return output_depth, target_depth, output_heatmap, target_heatmap, chamfer


def _reference(od, td, oh, th, ch, cfg):
    od, td, oh, th = (x.astype(jnp.float32) for x in (od, td, oh, th))
    neg_w = cfg["heatmap_negative_weight"]
    pos_w = 1.0 - neg_w
    mf = (td > 0).astype(jnp.float32)
    cnt = jnp.sum(mf)
    depth = jnp.sum(jnp.abs(td - od) * mf) / cnt
    log_o = jnp.maximum(jnp.log(oh), -100.0)
    log_1mo = jnp.maximum(jnp.log(1.0 - oh), -100.0)
    bce = -(th * log_o + (1.0 - th) * log_1mo)
    bal = jnp.where(th > 0, pos_w, neg_w)
    heat = jnp.sum(bce * bal * mf) / cnt
    total = cfg["depth_pred_loss_weight"] * depth + cfg["heatmap_loss_weight"] * heat
    if ch is not None and cfg.get("chamfer_loss_weight", 0) > 0:
        ch = ch.astype(jnp.float32)
        mc = (ch > 0).astype(jnp.float32)
        cham = jnp.sum((-log_1mo) * ch ** 2 * mc) / jnp.sum(mc)
        total = total + cfg["chamfer_loss_weight"] * cham
    return total


def _run_case(key, shape, with_chamfer, config, dtype=jnp.float32, tol=1e-4):
    od, td, oh, th, ch = _make_inputs(key, shape)
    if dtype != jnp.float32:
        od, td, oh, th, ch = (x.astype(dtype) for x in (od, td, oh, th, ch))
    ch_in = ch if with_chamfer else None
    loss, _ = plain_loss({"epoch": 0, "output_depth": od, "target_depth": td,
                          "output_heatmap": oh, "target_heatmap": th,
                          "chamfer_offset_map": ch_in}, config)
    loss = jax.block_until_ready(loss)
    exp = jax.block_until_ready(_reference(od, td, oh, th, ch_in, config["loss"]))
    assert jnp.allclose(loss, exp, rtol=tol, atol=tol), (shape, dtype, loss, exp)


if __name__ == "__main__":
    cfg = {"depth_pred_loss_weight": 1.0,
           "heatmap_loss_weight": 1.0,
           "heatmap_negative_weight": 0.1,
           "chamfer_loss_weight": 0.5}
    config = {"loss": cfg}

    root = jax.random.PRNGKey(0)
    k1, k2, k3, k4 = jax.random.split(root, 4)

    # Case 1: 128-aligned element count, chamfer term present (5 f32 streams).
    _run_case(k1, (2, 1, 32, 32), with_chamfer=True, config=config)

    # Case 2: non-aligned element count (JAX lane tail), no chamfer (4 streams).
    _run_case(k2, (2, 1, 30, 30), with_chamfer=False, config=config)

    # Case 3: native bf16 inputs (no wrapper upcast), chamfer present.
    _run_case(k3, (2, 1, 32, 32), with_chamfer=True, config=config,
              dtype=jnp.bfloat16, tol=1e-3)

    # Case 4: larger map exercising the chunked (fori_loop) tile body + masked tail.
    _run_case(k4, (2, 1, 128, 144), with_chamfer=True, config=config)

    print("KERNEL_OK")
</pallas_src>

<mosaic_0001>
module attributes {stable_mosaic.version = 11 : i64} {
  func.func @_loss_sums_kernel(%arg0: i32, %arg1: i32, %arg2: memref<16x128xf32, #tpu.memory_space<vmem>>, %arg3: memref<16x128xf32, #tpu.memory_space<vmem>>, %arg4: memref<16x128xf32, #tpu.memory_space<vmem>>, %arg5: memref<16x128xf32, #tpu.memory_space<vmem>>, %arg6: memref<16x128xf32, #tpu.memory_space<vmem>>, %arg7: memref<1x5x8x128xf32, #tpu.memory_space<vmem>>) attributes {dimension_semantics = [#tpu.dimension_semantics<parallel>, #tpu.dimension_semantics<arbitrary>], iteration_bounds = array<i64: 1, 1>, scalar_prefetch = 0 : i64, scratch_operands = 0 : i64, tpu.core_type = #tpu.core_type<tc>, window_params = [{transform_indices = @transform_0, window_bounds = array<i64: 16, 128>}, {transform_indices = @transform_1, window_bounds = array<i64: 16, 128>}, {transform_indices = @transform_2, window_bounds = array<i64: 16, 128>}, {transform_indices = @transform_3, window_bounds = array<i64: 16, 128>}, {transform_indices = @transform_4, window_bounds = array<i64: 16, 128>}, {transform_indices = @transform_5, window_bounds = array<i64: 1, 5, 8, 128>}]} {
    %c0_i32 = arith.constant 0 : i32
    %0 = arith.cmpi eq, %arg1, %c0_i32 : i32
    %1 = arith.extui %0 : i1 to i32
    %c0_i32_0 = arith.constant 0 : i32
    %2 = arith.cmpi ne, %1, %c0_i32_0 : i32
    scf.if %2 {
      %cst_61 = arith.constant 0.000000e+00 : f32
      %86 = vector.broadcast %cst_61 : f32 to vector<1x5x8x128xf32>
      %c0_62 = arith.constant 0 : index
      %c0_63 = arith.constant 0 : index
      %c0_64 = arith.constant 0 : index
      %c0_65 = arith.constant 0 : index
      %87 = vector.load %arg7[%c0_62, %c0_63, %c0_64, %c0_65] : memref<1x5x8x128xf32, #tpu.memory_space<vmem>>, vector<1x5x8x128xf32>
      tpu.vector_store %arg7[%c0_62, %c0_63, %c0_64, %c0_65], %86 {strides = array<i32>} : memref<1x5x8x128xf32, #tpu.memory_space<vmem>>, vector<1x5x8x128xf32>,
    } else {
    }
    %c0 = arith.constant 0 : index
    %c0_1 = arith.constant 0 : index
    %3 = vector.load %arg2[%c0, %c0_1] : memref<16x128xf32, #tpu.memory_space<vmem>>, vector<16x128xf32>
    %cst = arith.constant 0.000000e+00 : f32
    %4 = vector.broadcast %cst : f32 to vector<16x128xf32>
    %5 = arith.cmpf ogt, %3, %4 : vector<16x128xf32>
    %6 = arith.extui %5 : vector<16x128xi1> to vector<16x128xi32>
    %7 = arith.sitofp %6 : vector<16x128xi32> to vector<16x128xf32>
    %c0_2 = arith.constant 0 : index
    %c1 = arith.constant 1 : index
    %c0_3 = arith.constant 0 : index
    %c0_4 = arith.constant 0 : index
    %8 = vector.load %arg7[%c0_2, %c1, %c0_3, %c0_4] : memref<1x5x8x128xf32, #tpu.memory_space<vmem>>, vector<1x1x8x128xf32>
    %9 = vector.shape_cast %8 : vector<1x1x8x128xf32> to vector<8x128xf32>
    %10 = vector.shape_cast %7 : vector<16x128xf32> to vector<2x8x128xf32>
    %cst_5 = arith.constant dense<0.000000e+00> : vector<8x128xf32>
    %11 = vector.multi_reduction <add>, %10, %cst_5 [0] : vector<2x8x128xf32> to vector<8x128xf32>
    %12 = arith.addf %9, %11 : vector<8x128xf32>
    %c0_6 = arith.constant 0 : index
    %c1_7 = arith.constant 1 : index
    %c0_8 = arith.constant 0 : index
    %c0_9 = arith.constant 0 : index
    %13 = vector.load %arg7[%c0_6, %c1_7, %c0_8, %c0_9] : memref<1x5x8x128xf32, #tpu.memory_space<vmem>>, vector<1x1x8x128xf32>
    %14 = vector.shape_cast %13 : vector<1x1x8x128xf32> to vector<8x128xf32>
    %15 = vector.shape_cast %12 : vector<8x128xf32> to vector<1x1x8x128xf32>
    tpu.vector_store %arg7[%c0_6, %c1_7, %c0_8, %c0_9], %15 {strides = array<i32>} : memref<1x5x8x128xf32, #tpu.memory_space<vmem>>, vector<1x1x8x128xf32>,
    %c0_10 = arith.constant 0 : index
    %c0_11 = arith.constant 0 : index
    %16 = vector.load %arg3[%c0_10, %c0_11] : memref<16x128xf32, #tpu.memory_space<vmem>>, vector<16x128xf32>
    %c0_12 = arith.constant 0 : index
    %c0_13 = arith.constant 0 : index
    %c0_14 = arith.constant 0 : index
    %c0_15 = arith.constant 0 : index
    %17 = vector.load %arg7[%c0_12, %c0_13, %c0_14, %c0_15] : memref<1x5x8x128xf32, #tpu.memory_space<vmem>>, vector<1x1x8x128xf32>
    %18 = vector.shape_cast %17 : vector<1x1x8x128xf32> to vector<8x128xf32>
    %19 = arith.subf %3, %16 : vector<16x128xf32>
    %20 = math.absf %19 : vector<16x128xf32>
    %21 = arith.mulf %20, %7 : vector<16x128xf32>
    %22 = vector.shape_cast %21 : vector<16x128xf32> to vector<2x8x128xf32>
    %cst_16 = arith.constant dense<0.000000e+00> : vector<8x128xf32>
    %23 = vector.multi_reduction <add>, %22, %cst_16 [0] : vector<2x8x128xf32> to vector<8x128xf32>
    %24 = arith.addf %18, %23 : vector<8x128xf32>
    %c0_17 = arith.constant 0 : index
    %c0_18 = arith.constant 0 : index
    %c0_19 = arith.constant 0 : index
    %c0_20 = arith.constant 0 : index
    %25 = vector.load %arg7[%c0_17, %c0_18, %c0_19, %c0_20] : memref<1x5x8x128xf32, #tpu.memory_space<vmem>>, vector<1x1x8x128xf32>
    %26 = vector.shape_cast %25 : vector<1x1x8x128xf32> to vector<8x128xf32>
    %27 = vector.shape_cast %24 : vector<8x128xf32> to vector<1x1x8x128xf32>
    tpu.vector_store %arg7[%c0_17, %c0_18, %c0_19, %c0_20], %27 {strides = array<i32>} : memref<1x5x8x128xf32, #tpu.memory_space<vmem>>, vector<1x1x8x128xf32>,
    %c0_21 = arith.constant 0 : index
    %c0_22 = arith.constant 0 : index
    %28 = vector.load %arg4[%c0_21, %c0_22] : memref<16x128xf32, #tpu.memory_space<vmem>>, vector<16x128xf32>
    %cst_23 = arith.constant 1.000000e+00 : f32
    %29 = vector.broadcast %cst_23 : f32 to vector<16x128xf32>
    %30 = arith.subf %29, %28 : vector<16x128xf32>
    %31 = math.log %30 : vector<16x128xf32>
    %cst_24 = arith.constant -1.000000e+02 : f32
    %32 = vector.broadcast %cst_24 : f32 to vector<16x128xf32>
    %33 = arith.maximumf %31, %32 : vector<16x128xf32>
    %c0_25 = arith.constant 0 : index
    %c0_26 = arith.constant 0 : index
    %34 = vector.load %arg5[%c0_25, %c0_26] : memref<16x128xf32, #tpu.memory_space<vmem>>, vector<16x128xf32>
    %35 = math.log %28 : vector<16x128xf32>
    %cst_27 = arith.constant -1.000000e+02 : f32
    %36 = vector.broadcast %cst_27 : f32 to vector<16x128xf32>
    %37 = arith.maximumf %35, %36 : vector<16x128xf32>
    %38 = arith.mulf %34, %37 : vector<16x128xf32>
    %cst_28 = arith.constant 1.000000e+00 : f32
    %39 = vector.broadcast %cst_28 : f32 to vector<16x128xf32>
    %40 = arith.subf %39, %34 : vector<16x128xf32>
    %41 = arith.mulf %40, %33 : vector<16x128xf32>
    %42 = arith.addf %38, %41 : vector<16x128xf32>
    %cst_29 = arith.constant 0.000000e+00 : f32
    %43 = vector.broadcast %cst_29 : f32 to vector<16x128xf32>
    %44 = arith.subf %43, %42 : vector<16x128xf32>
    %cst_30 = arith.constant 0.000000e+00 : f32
    %45 = vector.broadcast %cst_30 : f32 to vector<16x128xf32>
    %46 = arith.cmpf ogt, %34, %45 : vector<16x128xf32>
    %cst_31 = arith.constant 0.899999976 : f32
    %cst_32 = arith.constant 1.000000e-01 : f32
    %47 = vector.broadcast %cst_31 : f32 to vector<16x128xf32>
    %48 = vector.broadcast %cst_32 : f32 to vector<16x128xf32>
    %49 = arith.select %46, %47, %48 : vector<16x128xi1>, vector<16x128xf32>
    %c0_33 = arith.constant 0 : index
    %c2 = arith.constant 2 : index
    %c0_34 = arith.constant 0 : index
    %c0_35 = arith.constant 0 : index
    %50 = vector.load %arg7[%c0_33, %c2, %c0_34, %c0_35] : memref<1x5x8x128xf32, #tpu.memory_space<vmem>>, vector<1x1x8x128xf32>
    %51 = vector.shape_cast %50 : vector<1x1x8x128xf32> to vector<8x128xf32>
    %52 = arith.mulf %44, %49 : vector<16x128xf32>
    %53 = arith.mulf %52, %7 : vector<16x128xf32>
    %54 = vector.shape_cast %53 : vector<16x128xf32> to vector<2x8x128xf32>
    %cst_36 = arith.constant dense<0.000000e+00> : vector<8x128xf32>
    %55 = vector.multi_reduction <add>, %54, %cst_36 [0] : vector<2x8x128xf32> to vector<8x128xf32>
    %56 = arith.addf %51, %55 : vector<8x128xf32>
    %c0_37 = arith.constant 0 : index
    %c2_38 = arith.constant 2 : index
    %c0_39 = arith.constant 0 : index
    %c0_40 = arith.constant 0 : index
    %57 = vector.load %arg7[%c0_37, %c2_38, %c0_39, %c0_40] : memref<1x5x8x128xf32, #tpu.memory_space<vmem>>, vector<1x1x8x128xf32>
    %58 = vector.shape_cast %57 : vector<1x1x8x128xf32> to vector<8x128xf32>
    %59 = vector.shape_cast %56 : vector<8x128xf32> to vector<1x1x8x128xf32>
    tpu.vector_store %arg7[%c0_37, %c2_38, %c0_39, %c0_40], %59 {strides = array<i32>} : memref<1x5x8x128xf32, #tpu.memory_space<vmem>>, vector<1x1x8x128xf32>,
    %c0_41 = arith.constant 0 : index
    %c0_42 = arith.constant 0 : index
    %60 = vector.load %arg6[%c0_41, %c0_42] : memref<16x128xf32, #tpu.memory_space<vmem>>, vector<16x128xf32>
    %cst_43 = arith.constant 0.000000e+00 : f32
    %61 = vector.broadcast %cst_43 : f32 to vector<16x128xf32>
    %62 = arith.cmpf ogt, %60, %61 : vector<16x128xf32>
    %63 = arith.extui %62 : vector<16x128xi1> to vector<16x128xi32>
    %64 = arith.sitofp %63 : vector<16x128xi32> to vector<16x128xf32>
    %c0_44 = arith.constant 0 : index
    %c3 = arith.constant 3 : index
    %c0_45 = arith.constant 0 : index
    %c0_46 = arith.constant 0 : index
    %65 = vector.load %arg7[%c0_44, %c3, %c0_45, %c0_46] : memref<1x5x8x128xf32, #tpu.memory_space<vmem>>, vector<1x1x8x128xf32>
    %66 = vector.shape_cast %65 : vector<1x1x8x128xf32> to vector<8x128xf32>
    %cst_47 = arith.constant 0.000000e+00 : f32
    %67 = vector.broadcast %cst_47 : f32 to vector<16x128xf32>
    %68 = arith.subf %67, %33 : vector<16x128xf32>
    %69 = arith.mulf %60, %60 : vector<16x128xf32>
    %70 = arith.mulf %68, %69 : vector<16x128xf32>
    %71 = arith.mulf %70, %64 : vector<16x128xf32>
    %72 = vector.shape_cast %71 : vector<16x128xf32> to vector<2x8x128xf32>
    %cst_48 = arith.constant dense<0.000000e+00> : vector<8x128xf32>
    %73 = vector.multi_reduction <add>, %72, %cst_48 [0] : vector<2x8x128xf32> to vector<8x128xf32>
    %74 = arith.addf %66, %73 : vector<8x128xf32>
    %c0_49 = arith.constant 0 : index
    %c3_50 = arith.constant 3 : index
    %c0_51 = arith.constant 0 : index
    %c0_52 = arith.constant 0 : index
    %75 = vector.load %arg7[%c0_49, %c3_50, %c0_51, %c0_52] : memref<1x5x8x128xf32, #tpu.memory_space<vmem>>, vector<1x1x8x128xf32>
    %76 = vector.shape_cast %75 : vector<1x1x8x128xf32> to vector<8x128xf32>
    %77 = vector.shape_cast %74 : vector<8x128xf32> to vector<1x1x8x128xf32>
    tpu.vector_store %arg7[%c0_49, %c3_50, %c0_51, %c0_52], %77 {strides = array<i32>} : memref<1x5x8x128xf32, #tpu.memory_space<vmem>>, vector<1x1x8x128xf32>,
    %c0_53 = arith.constant 0 : index
    %c4 = arith.constant 4 : index
    %c0_54 = arith.constant 0 : index
    %c0_55 = arith.constant 0 : index
    %78 = vector.load %arg7[%c0_53, %c4, %c0_54, %c0_55] : memref<1x5x8x128xf32, #tpu.memory_space<vmem>>, vector<1x1x8x128xf32>
    %79 = vector.shape_cast %78 : vector<1x1x8x128xf32> to vector<8x128xf32>
    %80 = vector.shape_cast %64 : vector<16x128xf32> to vector<2x8x128xf32>
    %cst_56 = arith.constant dense<0.000000e+00> : vector<8x128xf32>
    %81 = vector.multi_reduction <add>, %80, %cst_56 [0] : vector<2x8x128xf32> to vector<8x128xf32>
    %82 = arith.addf %79, %81 : vector<8x128xf32>
    %c0_57 = arith.constant 0 : index
    %c4_58 = arith.constant 4 : index
    %c0_59 = arith.constant 0 : index
    %c0_60 = arith.constant 0 : index
    %83 = vector.load %arg7[%c0_57, %c4_58, %c0_59, %c0_60] : memref<1x5x8x128xf32, #tpu.memory_space<vmem>>, vector<1x1x8x128xf32>
    %84 = vector.shape_cast %83 : vector<1x1x8x128xf32> to vector<8x128xf32>
    %85 = vector.shape_cast %82 : vector<8x128xf32> to vector<1x1x8x128xf32>
    tpu.vector_store %arg7[%c0_57, %c4_58, %c0_59, %c0_60], %85 {strides = array<i32>} : memref<1x5x8x128xf32, #tpu.memory_space<vmem>>, vector<1x1x8x128xf32>,
    return
  }
  func.func @transform_0(%arg0: i32, %arg1: i32) -> (i32, i32) {
    %c1_i32 = arith.constant 1 : i32
    %0 = arith.muli %arg0, %c1_i32 : i32
    %1 = arith.addi %0, %arg1 : i32
    %c0_i32 = arith.constant 0 : i32
    %c0_i32_0 = arith.constant 0 : i32
    return %1, %c0_i32 : i32, i32
  }
  func.func @transform_1(%arg0: i32, %arg1: i32) -> (i32, i32) {
    %c1_i32 = arith.constant 1 : i32
    %0 = arith.muli %arg0, %c1_i32 : i32
    %1 = arith.addi %0, %arg1 : i32
    %c0_i32 = arith.constant 0 : i32
    %c0_i32_0 = arith.constant 0 : i32
    return %1, %c0_i32 : i32, i32
  }
  func.func @transform_2(%arg0: i32, %arg1: i32) -> (i32, i32) {
    %c1_i32 = arith.constant 1 : i32
    %0 = arith.muli %arg0, %c1_i32 : i32
    %1 = arith.addi %0, %arg1 : i32
    %c0_i32 = arith.constant 0 : i32
    %c0_i32_0 = arith.constant 0 : i32
    return %1, %c0_i32 : i32, i32
  }
  func.func @transform_3(%arg0: i32, %arg1: i32) -> (i32, i32) {
    %c1_i32 = arith.constant 1 : i32
    %0 = arith.muli %arg0, %c1_i32 : i32
    %1 = arith.addi %0, %arg1 : i32
    %c0_i32 = arith.constant 0 : i32
    %c0_i32_0 = arith.constant 0 : i32
    return %1, %c0_i32 : i32, i32
  }
  func.func @transform_4(%arg0: i32, %arg1: i32) -> (i32, i32) {
    %c1_i32 = arith.constant 1 : i32
    %0 = arith.muli %arg0, %c1_i32 : i32
    %1 = arith.addi %0, %arg1 : i32
    %c0_i32 = arith.constant 0 : i32
    %c0_i32_0 = arith.constant 0 : i32
    return %1, %c0_i32 : i32, i32
  }
  func.func @transform_5(%arg0: i32, %arg1: i32) -> (i32, i32, i32, i32) {
    %c0_i32 = arith.constant 0 : i32
    %c0_i32_0 = arith.constant 0 : i32
    %c0_i32_1 = arith.constant 0 : i32
    %c0_i32_2 = arith.constant 0 : i32
    return %arg0, %c0_i32, %c0_i32_0, %c0_i32_1 : i32, i32, i32, i32
  }
}

</mosaic_0001>

<bundles_post_ra>
// kernel: tpu_custom_call.1
= control target key start
LH: loop header
LB: loop body
LE: loop exit
PB: predicated region body
PF: predicated region fallthrough
CT: control target
= control target key end

     0   :  { %10 = vsyncpa [#allocation3], 0  ;;  %s511_s0 = inlined_call_operand.hbm [shape: f32[16,128], index: 0, kind: input, shape index: {}]   ;;  %s512_s1 = inlined_call_operand.hbm [shape: f32[16,128], index: 1, kind: input, shape index: {}]   ;;  %s513_s2 = inlined_call_operand.hbm [shape: f32[16,128], index: 2, kind: input, shape index: {}]   ;;  %s514_s3 = inlined_call_operand.hbm [shape: f32[16,128], index: 3, kind: input, shape index: {}]   ;;  %s515_s4 = inlined_call_operand.hbm [shape: f32[16,128], index: 4, kind: input, shape index: {}]   ;;  %s516_s5 = inlined_call_operand.hbm [shape: f32[1,5,8,128], index: 5, kind: output, shape index: {}]  }
   0x1   :  { %11 = vsyncpa [#allocation6], 0 }
   0x2   :  { %12 = vsyncpa [#allocation9], 0 }
   0x3   :  { %13 = vsyncpa [#allocation4], 0  ;;  %s39_s20 = sshll.u32 %s512_s1, 4  ;;  %s425_s21 = smov [#allocation5]   ;;  %s40_s20 = int_to_ptr.hbm [resolvable:$true] %s39_s20 }
   0x4   :  { %s41_s22 = sshll.u32 %s425_s21, 4  ;;  %s73_s25 = sshll.u32 %s514_s3, 4  ;;  %s42_s22 = int_to_ptr.vmem [resolvable:$true] %s41_s22  ;;  %s74_s25 = int_to_ptr.hbm [resolvable:$true] %s73_s25 }
   0x5   :  { %s426_s26 = smov 128   ;;  %s427_s27 = smov 8  }
   0x6   :  { %47 = dma.hbm_to_vmem [thread:$0]  %s40_s20, 256, %s42_s22, [#allocation6], %s426_s26, %s426_s26, %s427_s27  }
   0x7   :  { %s428_s28 = smov [#allocation8]   ;;  %s22_s1 = sshll.u32 %s511_s0, 4  ;;  %s23_s1 = int_to_ptr.hbm [resolvable:$true] %s22_s1 }
   0x8   :  { %s75_s29 = sshll.u32 %s428_s28, 4  ;;  %s56_s8 = sshll.u32 %s513_s2, 4  ;;  %s76_s29 = int_to_ptr.vmem [resolvable:$true] %s75_s29  ;;  %s57_s8 = int_to_ptr.hbm [resolvable:$true] %s56_s8 }
   0x9   :  { %81 = dma.hbm_to_vmem [thread:$0]  %s74_s25, 256, %s76_s29, [#allocation9], %s426_s26, %s426_s26, %s427_s27  }
   0xa   :  { %s429_s9 = smov [#allocation2]   ;;  %s430_s11 = smov [#allocation7]  }
   0xb   :  { %s24_s10 = sshll.u32 %s429_s9, 4  ;;  %s58_s0 = sshll.u32 %s430_s11, 4  ;;  %s25_s10 = int_to_ptr.vmem [resolvable:$true] %s24_s10  ;;  %s59_s0 = int_to_ptr.vmem [resolvable:$true] %s58_s0 }
   0xc   :  { %30 = dma.hbm_to_vmem [thread:$0]  %s23_s1, 256, %s25_s10, [#allocation3], %s426_s26, %s426_s26, %s427_s27  }
   0xd   :  { %s90_s14 = sshll.u32 %s515_s4, 4  ;;  %s431_s2 = smov [#allocation10]   ;;  %s91_s14 = int_to_ptr.hbm [resolvable:$true] %s90_s14 }
   0xe   :  { %64 = dma.hbm_to_vmem [thread:$0]  %s57_s8, 256, %s59_s0, [#allocation6], %s426_s26, %s426_s26, %s427_s27  }
   0xf   :  { %s92_s15 = sshll.u32 %s431_s2, 4  ;;  %s93_s15 = int_to_ptr.vmem [resolvable:$true] %s92_s15 }
  0x10   :  { %98 = dma.hbm_to_vmem [thread:$0]  %s91_s14, 256, %s93_s15, [#allocation9], %s426_s26, %s426_s26, %s427_s27  }
  0x11   :  { %417 = dma.done.wait [#allocation3], 256  }
  0x12   :  { %418 = vsyncadd [#allocation3], 4294967040 }
  0x13   :  { %419 = dma.done.wait [#allocation6], 512  }
  0x14   :  { %420 = vsyncadd [#allocation6], 4294966784 }
  0x15   :  { %421 = dma.done.wait [#allocation9], 512  }
  0x16   :  { %422 = vsyncadd [#allocation9], 4294966784  ;;  %v138_v0 = vld [vmem:[#allocation2] sm:$0xff]  ;;  %v139_v1 = vld [vmem:[#allocation2 + $0x8] sm:$0xff]  ;;  %v432_v7 = vmov 0.0   ;;  %s434_s4 = smov [#allocation11]  }
  0x17   :  { %v151_v2 = vld [vmem:[#allocation5] sm:$0xff]  ;;  %vm140_vm0 = vcmp.gt.f32.partialorder %v138_v0, 0.0  ;;  %vm141_vm1 = vcmp.gt.f32.partialorder %v139_v1, 0.0  ;;  %v152_v3 = vld [vmem:[#allocation5 + $0x8] sm:$0xff]  ;;  %v163_v5 = vld [vmem:[#allocation7] sm:$0xff]  ;;  %s234_s16 = sshll.u32 %s434_s4, 4  ;;  %s235_s16 = int_to_ptr.vmem [resolvable:$true] %s234_s16 }
  0x18   :  { %v154_v4 = vsub.f32 %v138_v0, %v151_v2  ;;  %v164_v6 = vld [vmem:[#allocation7 + $0x8] sm:$0xff]  ;;  %v495_v8 = vsel %vm140_vm0, 1.0, %v432_v7  ;;  %v497_v9 = vsel %vm141_vm1, 1.0, %v432_v7  ;;  %v155_v10 = vsub.f32 %v139_v1, %v152_v3  ;;  %v204_v18 = vld [vmem:[#allocation10] sm:$0xff]  ;;  %v173_v21 = vld [vmem:[#allocation8] sm:$0xff]  ;;  %s236_s19 = sshll.u32 %s516_s5, 4  ;;  %s237_s19 = int_to_ptr.hbm [resolvable:$true] %s236_s19 }
  0x19   :  { %v165_v11 = vsub.f32 1.0, %v163_v5  ;;  %v148_v12 = vadd.f32 %v497_v9, %v495_v8  ;;  %v166_v14 = vsub.f32 1.0, %v164_v6  ;;  %265 = vlog2.f32 %v163_v5  ;;  %v205_v19 = vld [vmem:[#allocation10 + $0x8] sm:$0xff]  ;;  %v174_v25 = vld [vmem:[#allocation8 + $0x8] sm:$0xff] }
  0x1a   :  { %v156_v13 = vand.u32 2147483647, %v154_v4  ;;  %v157_v15 = vand.u32 2147483647, %v155_v10  ;;  %vm206_vm2 = vcmp.gt.f32.partialorder %v204_v18, 0.0  ;;  %vm207_vm3 = vcmp.gt.f32.partialorder %v205_v19, 0.0 }
  0x1b   :  { %267 = vlog2.f32 %v165_v11  ;;  %150 = vst [vmem:[#allocation11 + $0x8] sm:$0xff] %v148_v12  ;;  %v253_v22 = vsel %vm206_vm2, 1.0, %v432_v7  ;;  %v254_v23 = vsel %vm207_vm3, 1.0, %v432_v7  ;;  %v183_v31 = vsub.f32 1.0, %v173_v21 }
  0x1c   :  { %v158_v16 = vmul.f32 %v495_v8, %v156_v13  ;;  %269 = vlog2.f32 %v166_v14  ;;  %v159_v17 = vmul.f32 %v497_v9, %v157_v15  ;;  %v227_v26 = vadd.f32 %v254_v23, %v253_v22 }
  0x1d   :  { %271 = vlog2.f32 %v164_v6  ;;  %v184_v35 = vsub.f32 1.0, %v174_v25  ;;  %v216_v38 = vmul.f32 %v204_v18, %v204_v18  ;;  %v217_v41 = vmul.f32 %v205_v19, %v205_v19 }
  0x1e   :  { %v160_v20 = vadd.f32 %v159_v17, %v158_v16  ;;  %229 = vst [vmem:[#allocation11 + $0x20] sm:$0xff] %v227_v26  ;;  %vm191_vm4 = vcmp.gt.f32.partialorder %v173_v21, 0.0  ;;  %vm192_vm5 = vcmp.gt.f32.partialorder %v174_v25, 0.0  ;;  %v433_v50 = vmov 0.1  }
  0x1f   :  { %v266_v24 = vpop.eup %265  ;;  %v193_v51 = vsel %vm191_vm4, 0.9, %v433_v50  ;;  %v194_v56 = vsel %vm192_vm5, 0.9, %v433_v50 }
  0x20   :  { %v176_v28 = vmul.f32 0.6931472, %v266_v24  ;;  %162 = vst [vmem:[#allocation11] sm:$0xff] %v160_v20 }
  0x21   :  { %v268_v27 = vpop.eup %267 }
  0x22   :  { %v270_v29 = vpop.eup %269  ;;  %v168_v30 = vmul.f32 0.6931472, %v268_v27  ;;  %v179_v34 = vmax.f32 %v176_v28, -100.0 }
  0x23   :  { %v272_v32 = vpop.eup %271  ;;  %v170_v33 = vmul.f32 0.6931472, %v270_v29 }
  0x24   :  { %v171_v36 = vmax.f32 %v168_v30, -100.0  ;;  %v178_v37 = vmul.f32 0.6931472, %v272_v32  ;;  %v181_v40 = vmul.f32 %v179_v34, %v173_v21 }
  0x25   :  { %v172_v39 = vmax.f32 %v170_v33, -100.0 }
  0x26   :  { %v180_v42 = vmax.f32 %v178_v37, -100.0  ;;  %v185_v43 = vmul.f32 %v183_v31, %v171_v36  ;;  %v214_v44 = vsub.f32 0.0, %v171_v36 }
  0x27   :  { %v186_v45 = vmul.f32 %v184_v35, %v172_v39  ;;  %v215_v46 = vsub.f32 0.0, %v172_v39 }
  0x28   :  { %v182_v47 = vmul.f32 %v180_v42, %v174_v25  ;;  %v187_v48 = vadd.f32 %v185_v43, %v181_v40  ;;  %v218_v49 = vmul.f32 %v216_v38, %v214_v44 }
  0x29   :  { %v219_v52 = vmul.f32 %v217_v41, %v215_v46 }
  0x2a   :  { %v188_v53 = vadd.f32 %v186_v45, %v182_v47  ;;  %v189_v54 = vsub.f32 0.0, %v187_v48  ;;  %v220_v55 = vmul.f32 %v253_v22, %v218_v49 }
  0x2b   :  { %v221_v57 = vmul.f32 %v254_v23, %v219_v52 }
  0x2c   :  { %v190_v58 = vsub.f32 0.0, %v188_v53  ;;  %v197_v59 = vmul.f32 %v193_v51, %v189_v54 }
  0x2d   :  { %v222_v60 = vadd.f32 %v221_v57, %v220_v55 }
  0x2e   :  { %v198_v61 = vmul.f32 %v194_v56, %v190_v58  ;;  %v199_v62 = vmul.f32 %v495_v8, %v197_v59 }
  0x2f   :  { %224 = vst [vmem:[#allocation11 + $0x18] sm:$0xff] %v222_v60 }
  0x30   :  { %v200_v63 = vmul.f32 %v497_v9, %v198_v61 }
  0x32   :  { %v201_v0 = vadd.f32 %v200_v63, %v199_v62 }
  0x34   :  { %203 = vst [vmem:[#allocation11 + $0x10] sm:$0xff] %v201_v0 }
  0x35   :  { %242 = dma.vmem_to_hbm [thread:$0]  %s235_s16, 640, %s237_s19, [#allocation4], %s426_s26, %s426_s26, %s427_s27  }
  0x36   :  { %423 = dma.done.wait [#allocation4], 640  }
  0x37   :  { %424 = vsyncadd [#allocation4], 4294966656 }
  0x38   :  { %247 = vsyncpa [#allocation3], 1 }
  0x39   :  { %248 = vsyncpa [#allocation6], 1 }
  0x3a   :  { %249 = vsyncpa [#allocation9], 1 }
  0x3b   :  { %250 = vsyncpa [#allocation4], 1 }

</bundles_post_ra>
